<compile_context>
chip_gen: v7x
topology: tpu7x:2x2x1
jax: 0.10.0
libtpu: 0.0.40
codegen_flags: <defaults>
</compile_context>

<pallas_src>
import functools

import jax
import jax.numpy as jnp
import numpy as np
from jax.experimental import pallas as pl
from jax.experimental.pallas import tpu as pltpu


_TARGET_BLOCK_BYTES = 4 * 1024 * 1024   # per input block (x2 inputs, x2 buffers)


def _iou_stats_kernel(logits_ref, labels_ref, out_ref, *,
                      tile_d, d_total, num_d_tiles, d_tiles_per_split,
                      mask_tail):
    """Accumulates per-row [intersection, sum(m1)+sum(m2)] over D tiles."""
    s = pl.program_id(0)          # D-split index (usually a single split)
    j = pl.program_id(2)          # D-tile index within the split

    @pl.when(j == 0)
    def _init():
        out_ref[...] = jnp.zeros_like(out_ref)

    x = logits_ref[...]
    # sigmoid(x) > 0.5  <=>  x > 0  (exact; avoids the EUP sigmoid chain).
    m1 = (x > 0).astype(jnp.float32)
    # Labels are used as-is (not thresholded), matching the PyTorch forward.
    m2 = labels_ref[...].astype(jnp.float32)

    def _accum(a, b):
        inter = jnp.sum(a * b, axis=1, keepdims=True)
        s12 = jnp.sum(a + b, axis=1, keepdims=True)
        out_ref[...] += jnp.concatenate([inter, s12], axis=1)

    if mask_tail:
        global_j = s * d_tiles_per_split + j
        is_last = global_j == num_d_tiles - 1

        @pl.when(is_last)
        def _tail():
            # Only the final D tile runs past the array; zero invalid lanes
            # (jnp.where, not multiply, so garbage/NaN in the pad is safe).
            col = (jax.lax.broadcasted_iota(jnp.int32, x.shape, 1)
                   + global_j * tile_d)
            valid = col < d_total
            _accum(jnp.where(valid, m1, 0.0), jnp.where(valid, m2, 0.0))

        @pl.when(jnp.logical_not(is_last))
        def _fast():
            _accum(m1, m2)
    else:
        _accum(m1, m2)


def _choose_blocks(n, d, itemsize_lg, itemsize_lb):
    """Pick (block_n, tile_d, mask_tail) targeting ~4 MiB per input block."""
    # Dtype-aware row blocking: keep vreg sublanes fully packed.
    min_item = min(itemsize_lg, itemsize_lb, 4)
    if min_item <= 1:
        block_n = 32
    elif min_item == 2:
        block_n = 16
    else:
        block_n = 8
    if n < block_n:
        block_n = n          # full-dim block is always legal

    max_item = max(itemsize_lg, itemsize_lb)
    bytes_per_col = block_n * max_item
    tile_d = max(128, (_TARGET_BLOCK_BYTES // bytes_per_col) // 128 * 128)
    if tile_d >= d:
        # Single block over the whole feature axis: no tail, minimal steps.
        return block_n, d, False

    # Prefer an exact multiple-of-128 divisor of D near the target so the
    # steady state never pays for tail masking.
    if d % 128 == 0:
        cand = tile_d
        floor = max(128, tile_d // 4)
        while cand >= floor:
            if d % cand == 0:
                return block_n, cand, False
            cand -= 128
    return block_n, tile_d, (d % tile_d != 0)


@jax.jit
def iou_accuracy(logits, labels):
    """Pallas implementation of IouAccuracy_v1.forward."""
    N = logits.shape[0]
    D = int(np.prod(logits.shape[1:]))
    assert D > 0, "empty feature axis"

    # Row-major flatten, identical to torch .view(N, -1). No cast, no pad.
    lg = logits.reshape(N, D)
    lb = labels.reshape(N, D)

    block_n, tile_d, mask_tail = _choose_blocks(
        N, D, lg.dtype.itemsize, lb.dtype.itemsize)

    grid_n = pl.cdiv(N, block_n)
    num_d_tiles = pl.cdiv(D, tile_d)

    # Small-batch path: split the D reduction across a leading "parallel"
    # axis so a second TensorCore (v7x) has independent work to stream.
    n_splits = 2 if (grid_n < 2 and num_d_tiles >= 4
                     and num_d_tiles % 2 == 0) else 1
    d_tiles_per_split = num_d_tiles // n_splits

    kernel = functools.partial(
        _iou_stats_kernel,
        tile_d=tile_d, d_total=D, num_d_tiles=num_d_tiles,
        d_tiles_per_split=d_tiles_per_split, mask_tail=mask_tail)

    in_map = lambda s, i, j: (i, s * d_tiles_per_split + j)
    out_map = lambda s, i, j: (s, i, 0)

    stats = pl.pallas_call(
        kernel,
        out_shape=jax.ShapeDtypeStruct((n_splits, N, 2), jnp.float32),
        grid_spec=pltpu.PrefetchScalarGridSpec(
            num_scalar_prefetch=0,
            grid=(n_splits, grid_n, d_tiles_per_split),
            in_specs=[
                pl.BlockSpec((block_n, tile_d), in_map),
                pl.BlockSpec((block_n, tile_d), in_map),
            ],
            out_specs=pl.BlockSpec((None, block_n, 2), out_map),
        ),
        compiler_params=pltpu.CompilerParams(
            dimension_semantics=("parallel", "parallel", "arbitrary"),
            vmem_limit_bytes=48 * 1024 * 1024,
        ),
    )(lg, lb)

    # Tiny O(N) epilogue, fused into the same jit.
    smooth = 1e-12
    stats = stats.sum(axis=0)                 # combine D-splits: (N, 2)
    inter = stats[:, 0]
    union = stats[:, 1] - inter               # sum(m1)+sum(m2) - inter
    score = inter / (union + smooth)
    return score.sum() / N


def _reference(logits, labels):
    """Pure-JAX replica of the PyTorch forward for verification."""
    N = logits.shape[0]
    probs = (jax.nn.sigmoid(logits.astype(jnp.float32)) > 0.5).astype(jnp.float32)
    m1 = probs.reshape(N, -1)
    m2 = labels.reshape(N, -1).astype(jnp.float32)
    inter = (m1 * m2).sum(axis=1)
    union = m1.sum(axis=1) + m2.sum(axis=1) - inter
    score = inter / (union + 1e-12)
    return score.sum() / N


if __name__ == "__main__":
    key = jax.random.PRNGKey(0)
    k1, k2, k3, k4 = jax.random.split(key, 4)

    # Primary test: segmentation-head-like shape, batch=2, ch=4, 16x16, f32.
    logits = jax.random.normal(k1, (2, 4, 16, 16), dtype=jnp.float32)
    labels = (jax.random.uniform(k2, (2, 4, 16, 16)) > 0.5).astype(jnp.float32)

    result = iou_accuracy(logits, labels)
    jax.block_until_ready(result)
    ref = _reference(logits, labels)
    assert jnp.allclose(result, ref, atol=1e-5, rtol=1e-5), (result, ref)

    # Secondary check: mixed dtypes (bf16 logits, bool labels), ragged dims.
    logits2 = jax.random.normal(k3, (3, 2, 9, 14), dtype=jnp.bfloat16)
    labels2 = jax.random.uniform(k4, (3, 2, 9, 14)) > 0.5
    result2 = iou_accuracy(logits2, labels2)
    jax.block_until_ready(result2)
    ref2 = _reference(logits2, labels2)
    assert jnp.allclose(result2, ref2, atol=1e-5, rtol=1e-5), (result2, ref2)

    print("KERNEL_OK")
</pallas_src>

<mosaic_0001>
module attributes {stable_mosaic.version = 11 : i64} {
  func.func @_iou_stats_kernel(%arg0: i32, %arg1: i32, %arg2: i32, %arg3: memref<2x1024xf32, #tpu.memory_space<vmem>>, %arg4: memref<2x1024xf32, #tpu.memory_space<vmem>>, %arg5: memref<1x2x2xf32, #tpu.memory_space<vmem>>) attributes {dimension_semantics = [#tpu.dimension_semantics<parallel>, #tpu.dimension_semantics<parallel>, #tpu.dimension_semantics<arbitrary>], iteration_bounds = array<i64: 1, 1, 1>, scalar_prefetch = 0 : i64, scratch_operands = 0 : i64, tpu.core_type = #tpu.core_type<tc>, window_params = [{transform_indices = @transform_0, window_bounds = array<i64: 2, 1024>}, {transform_indices = @transform_1, window_bounds = array<i64: 2, 1024>}, {transform_indices = @transform_2, window_bounds = array<i64: 1, 2, 2>}]} {
    %c0_i32 = arith.constant 0 : i32
    %0 = arith.cmpi eq, %arg2, %c0_i32 : i32
    %1 = arith.extui %0 : i1 to i32
    %c0_i32_0 = arith.constant 0 : i32
    %2 = arith.cmpi ne, %1, %c0_i32_0 : i32
    scf.if %2 {
      %cst_12 = arith.constant 0.000000e+00 : f32
      %22 = vector.broadcast %cst_12 : f32 to vector<2x2xf32>
      %c0_13 = arith.constant 0 : index
      %c0_14 = arith.constant 0 : index
      %c0_15 = arith.constant 0 : index
      %23 = vector.load %arg5[%c0_13, %c0_14, %c0_15] : memref<1x2x2xf32, #tpu.memory_space<vmem>>, vector<1x2x2xf32>
      %24 = vector.shape_cast %23 : vector<1x2x2xf32> to vector<2x2xf32>
      %25 = vector.shape_cast %22 : vector<2x2xf32> to vector<1x2x2xf32>
      tpu.vector_store %arg5[%c0_13, %c0_14, %c0_15], %25 {strides = array<i32>} : memref<1x2x2xf32, #tpu.memory_space<vmem>>, vector<1x2x2xf32>,
    } else {
    }
    %c0 = arith.constant 0 : index
    %c0_1 = arith.constant 0 : index
    %3 = vector.load %arg3[%c0, %c0_1] : memref<2x1024xf32, #tpu.memory_space<vmem>>, vector<2x1024xf32>
    %cst = arith.constant 0.000000e+00 : f32
    %4 = vector.broadcast %cst : f32 to vector<2x1024xf32>
    %5 = arith.cmpf ogt, %3, %4 : vector<2x1024xf32>
    %6 = arith.extui %5 : vector<2x1024xi1> to vector<2x1024xi32>
    %7 = arith.sitofp %6 : vector<2x1024xi32> to vector<2x1024xf32>
    %c0_2 = arith.constant 0 : index
    %c0_3 = arith.constant 0 : index
    %8 = vector.load %arg4[%c0_2, %c0_3] : memref<2x1024xf32, #tpu.memory_space<vmem>>, vector<2x1024xf32>
    %9 = arith.mulf %7, %8 : vector<2x1024xf32>
    %cst_4 = arith.constant dense<0.000000e+00> : vector<2xf32>
    %10 = vector.multi_reduction <add>, %9, %cst_4 [1] : vector<2x1024xf32> to vector<2xf32>
    %11 = vector.shape_cast %10 : vector<2xf32> to vector<2x1xf32>
    %12 = arith.addf %7, %8 : vector<2x1024xf32>
    %cst_5 = arith.constant dense<0.000000e+00> : vector<2xf32>
    %13 = vector.multi_reduction <add>, %12, %cst_5 [1] : vector<2x1024xf32> to vector<2xf32>
    %14 = vector.shape_cast %13 : vector<2xf32> to vector<2x1xf32>
    %c0_6 = arith.constant 0 : index
    %c0_7 = arith.constant 0 : index
    %c0_8 = arith.constant 0 : index
    %15 = vector.load %arg5[%c0_6, %c0_7, %c0_8] : memref<1x2x2xf32, #tpu.memory_space<vmem>>, vector<1x2x2xf32>
    %16 = vector.shape_cast %15 : vector<1x2x2xf32> to vector<2x2xf32>
    %17 = tpu.concatenate %11, %14 in 1 : vector<2x1xf32>, vector<2x1xf32> -> vector<2x2xf32>
    %18 = arith.addf %16, %17 : vector<2x2xf32>
    %c0_9 = arith.constant 0 : index
    %c0_10 = arith.constant 0 : index
    %c0_11 = arith.constant 0 : index
    %19 = vector.load %arg5[%c0_9, %c0_10, %c0_11] : memref<1x2x2xf32, #tpu.memory_space<vmem>>, vector<1x2x2xf32>
    %20 = vector.shape_cast %19 : vector<1x2x2xf32> to vector<2x2xf32>
    %21 = vector.shape_cast %18 : vector<2x2xf32> to vector<1x2x2xf32>
    tpu.vector_store %arg5[%c0_9, %c0_10, %c0_11], %21 {strides = array<i32>} : memref<1x2x2xf32, #tpu.memory_space<vmem>>, vector<1x2x2xf32>,
    return
  }
  func.func @transform_0(%arg0: i32, %arg1: i32, %arg2: i32) -> (i32, i32) {
    %c1_i32 = arith.constant 1 : i32
    %0 = arith.muli %arg0, %c1_i32 : i32
    %1 = arith.addi %0, %arg2 : i32
    %c0_i32 = arith.constant 0 : i32
    return %arg1, %1 : i32, i32
  }
  func.func @transform_1(%arg0: i32, %arg1: i32, %arg2: i32) -> (i32, i32) {
    %c1_i32 = arith.constant 1 : i32
    %0 = arith.muli %arg0, %c1_i32 : i32
    %1 = arith.addi %0, %arg2 : i32
    %c0_i32 = arith.constant 0 : i32
    return %arg1, %1 : i32, i32
  }
  func.func @transform_2(%arg0: i32, %arg1: i32, %arg2: i32) -> (i32, i32, i32) {
    %c0_i32 = arith.constant 0 : i32
    %c0_i32_0 = arith.constant 0 : i32
    return %arg0, %arg1, %c0_i32 : i32, i32, i32
  }
}

</mosaic_0001>

<bundles_post_ra>
// kernel: iou_accuracy.1
= control target key start
LH: loop header
LB: loop body
LE: loop exit
PB: predicated region body
PF: predicated region fallthrough
CT: control target
= control target key end

     0   :  { %v79_v0 = vlaneseq  ;;  %v224_v4 = vmov 1983009808   ;;  %v225_v8 = vmov 0.0   ;;  %vm117_vm2 = vcmask 1041408   ;;  %s281_s0 = inlined_call_operand.vmem [shape: f32[2,1024], index: 0, kind: input, shape index: {}]   ;;  %s282_s1 = inlined_call_operand.vmem [shape: f32[2,1024], index: 1, kind: input, shape index: {}]   ;;  %s283_s2 = inlined_call_operand.vmem [shape: f32[1,2,2], index: 2, kind: output, shape index: {}]  }
   0x1   :  { %v61_v1 = vld [vmem:[%s281_s0] sm:$0xff]  ;;  %v62_v2 = vld [vmem:[%s281_s0 + $0x8] sm:$0xff]  ;;  %v77_v5 = vunpack.c.l.s4 %v224_v4  ;;  %vm59_vm3 = vcmask 9216   ;;  %vm199_vm4 = vcmask 7168  }
   0x2   :  { %v69_v3 = vld [vmem:[%s282_s1] sm:$0xff]  ;;  %vm63_vm0 = vcmp.gt.f32.partialorder %v61_v1, 0.0  ;;  %vm64_vm1 = vcmp.gt.f32.partialorder %v62_v2, 0.0  ;;  %v70_v6 = vld [vmem:[%s282_s1 + $0x8] sm:$0xff]  ;;  %v80_v7 = vshrl.u32 %v79_v0, 7 }
   0x3   :  { %v220_v9 = vsel %vm63_vm0, 1.0, %v225_v8  ;;  %v221_v10 = vsel %vm64_vm1, 1.0, %v225_v8  ;;  %v78_v11 = vunpack.c.0.s8 %v77_v5  ;;  %60 = vst.msk [vmem:[%s283_s2] sm:$0x3] %vm59_vm3, %v225_v8 }
   0x4   :  { %v71_v12 = vmul.f32 %v220_v9, %v69_v3  ;;  %v72_v13 = vmul.f32 %v221_v10, %v70_v6  ;;  %v135_v14 = vadd.f32 %v220_v9, %v69_v3  ;;  %v136_v18 = vadd.f32 %v221_v10, %v70_v6 }
   0x5   :  { %v81_v15 = vsub.s32 %v78_v11, %v80_v7 }
   0x6   :  { %v75_v16 = vcombine.high %v71_v12, %v71_v12  ;;  %v139_v17 = vcombine.high %v135_v14, %v135_v14  ;;  %v92_v22 = vcombine.high %v72_v13, %v72_v13  ;;  %v156_v28 = vcombine.high %v136_v18, %v136_v18 }
   0x7   :  { %v82_v19 = vrot.slane %v71_v12, %v81_v15  ;;  %v146_v20 = vrot.slane %v135_v14, %v81_v15  ;;  %v99_v23 = vrot.slane %v72_v13, %v81_v15  ;;  %v163_v29 = vrot.slane %v136_v18, %v81_v15 }
   0x8   :  { %v89_v21 = vrot.slane %v75_v16, %v81_v15  ;;  %v153_v24 = vrot.slane %v139_v17, %v81_v15  ;;  %v106_v34 = vrot.slane %v92_v22, %v81_v15  ;;  %v170_v44 = vrot.slane %v156_v28, %v81_v15 }
   0x9   :  { %v90_v25 = vcombine.high %v82_v19, %v82_v19  ;;  %v118_v26 = vsel %vm117_vm2, %v82_v19, 0.0  ;;  %v154_v32 = vcombine.high %v146_v20, %v146_v20  ;;  %v107_v35 = vcombine.high %v99_v23, %v99_v23 }
   0xa   :  { %v91_v27 = vcombine.high %v89_v21, %v89_v21  ;;  %v121_v31 = vsel %vm117_vm2, %v89_v21, 0.0  ;;  %v155_v33 = vcombine.high %v153_v24, %v153_v24  ;;  %v181_v38 = vsel %vm117_vm2, %v146_v20, 0.0  ;;  %v198_v4 = vld [vmem:[%s283_s2] sm:$0x3] }
   0xb   :  { %v119_v30 = vsel %vm117_vm2, %v90_v25, 0.0  ;;  %v182_v39 = vsel %vm117_vm2, %v154_v32, 0.0  ;;  %v184_v40 = vsel %vm117_vm2, %v153_v24, 0.0  ;;  %v125_v43 = vsel %vm117_vm2, %v99_v23, 0.0 }
   0xc   :  { %v120_v36 = vadd.f32 %v119_v30, %v118_v26  ;;  %v123_v37 = vsel %vm117_vm2, %v91_v27, 0.0  ;;  %v183_v42 = vadd.f32 %v182_v39, %v181_v38  ;;  %v171_v45 = vcombine.high %v163_v29, %v163_v29 }
   0xd   :  { %v186_v46 = vsel %vm117_vm2, %v155_v33, 0.0  ;;  %v108_v49 = vcombine.high %v106_v34, %v106_v34  ;;  %v127_v50 = vsel %vm117_vm2, %v107_v35, 0.0  ;;  %v188_v51 = vsel %vm117_vm2, %v163_v29, 0.0 }
   0xe   :  { %v122_v41 = vadd.f32 %v121_v31, %v120_v36  ;;  %v185_v48 = vadd.f32 %v184_v40, %v183_v42  ;;  %v129_v54 = vsel %vm117_vm2, %v106_v34, 0.0  ;;  %v172_v55 = vcombine.high %v170_v44, %v170_v44 }
   0xf   :  { %v190_v56 = vsel %vm117_vm2, %v171_v45, 0.0  ;;  %v131_v59 = vsel %vm117_vm2, %v108_v49, 0.0  ;;  %v192_v60 = vsel %vm117_vm2, %v170_v44, 0.0 }
  0x10   :  { %v124_v47 = vadd.f32 %v123_v37, %v122_v41  ;;  %v187_v53 = vadd.f32 %v186_v46, %v185_v48  ;;  %v194_v63 = vsel %vm117_vm2, %v172_v55, 0.0 }
  0x12   :  { %v126_v52 = vadd.f32 %v125_v43, %v124_v47  ;;  %v189_v58 = vadd.f32 %v188_v51, %v187_v53 }
  0x14   :  { %v128_v57 = vadd.f32 %v127_v50, %v126_v52  ;;  %v191_v62 = vadd.f32 %v190_v56, %v189_v58 }
  0x16   :  { %v130_v61 = vadd.f32 %v129_v54, %v128_v57  ;;  %v193_v1 = vadd.f32 %v192_v60, %v191_v62 }
  0x18   :  { %v132_v0 = vadd.f32 %v131_v59, %v130_v61  ;;  %v195_v2 = vadd.f32 %v194_v63, %v193_v1 }
  0x1a   :  { %133 = vadd.xlane.f32.xlu0 %v132_v0 }
  0x1e   :  { %196 = vadd.xlane.f32.xlu0 %v195_v2 }
  0xa7   :  { %v134_v3 = vpop.xlane.xlu0 %133 }
  0xab   :  { %v197_v5 = vpop.xlane.xlu0 %196 }
  0xac   :  { %v200_v6 = vsel %vm199_vm4, %v134_v3, %v197_v5 }
  0xad   :  { %v201_v7 = vadd.f32 %v200_v6, %v198_v4 }
  0xaf   :  { %203 = vst.msk [vmem:[%s283_s2] sm:$0x3] %vm59_vm3, %v201_v7 }

</bundles_post_ra>
